<compile_context>
chip_gen: v6e
topology: v6e:2x2x1
jax: 0.10.0
libtpu: 0.0.40
codegen_flags: <defaults>
</compile_context>

<pallas_src>
import math

import jax
import jax.numpy as jnp
from jax.experimental import pallas as pl
from jax.experimental.pallas import tpu as pltpu

_LANES = 128


def _round_up(x, m):
    return (x + m - 1) // m * m


def _molweight_kernel(m_ref, a1_ref, a2_ref, beta_ref, mcr_ref, k1_ref, out_ref):
    M = m_ref[...]
    a1 = a1_ref[...]
    a2 = a2_ref[...]
    beta = beta_ref[...]
    Mcr = mcr_ref[...]
    k1 = k1_ref[...]

    d = M - Mcr
    z = beta * d
    # sigmoid(z) with a single EUP transcendental: 0.5 * (1 + tanh(z/2)).
    h = 0.5 * (1.0 + jnp.tanh(0.5 * z))
    # f_M = low_mw*(1-h) + high_mw*h  ==  k1 + a1*M + (a2-a1)*(M-Mcr)*h
    out_ref[...] = k1 + a1 * M + (a2 - a1) * d * h
    # TODO(synk): the PyTorch `(f_M > 4).any()` host-side debug-print branch has
    # no clean in-kernel equivalent; the caller can check the returned array.


def molweight(M, alpha_1, alpha_2, beta, Mcr, k_1, *,
              max_block_rows=2048, min_pallas_elems=1024):
    """MolWeight forward: lane-dense elementwise Pallas TPU kernel."""
    args = (M, alpha_1, alpha_2, beta, Mcr, k_1)
    shape = jnp.broadcast_shapes(*(jnp.shape(a) for a in args))
    dtype = jnp.float32
    n = int(math.prod(shape)) if shape else 1

    # Small-N fast path (the real Visc_PENN case, B ~ 8): kernel-launch and
    # tiling overhead would dwarf the math; let XLA fuse it into the model.
    if n <= min_pallas_elems:
        M_, a1_, a2_, b_, mcr_, k1_ = (jnp.asarray(a, dtype) for a in args)
        d = M_ - mcr_
        h = 0.5 * (1.0 + jnp.tanh(0.5 * (b_ * d)))
        return jnp.broadcast_to(k1_ + a1_ * M_ + (a2_ - a1_) * d * h, shape)

    # Lane-dense tiling: flat batch -> (rows, 128), rows padded to a multiple
    # of the 8-aligned block row count.
    rows = pl.cdiv(n, _LANES)
    block_rows = min(_round_up(max_block_rows, 8), _round_up(rows, 8))
    if rows > 8:
        # Ensure at least 2 blocks so v7x's two TensorCores both get work on
        # this mem-bound kernel (no effect on single-TC v5e/v6e correctness).
        block_rows = min(block_rows, _round_up(pl.cdiv(rows, 2), 8))
    rows_pad = _round_up(rows, block_rows)
    total = rows_pad * _LANES
    pad = total - n

    def _prep(a):
        flat = jnp.broadcast_to(jnp.asarray(a, dtype), shape).reshape(-1)
        if pad:
            flat = jnp.pad(flat, (0, pad))
        return flat.reshape(rows_pad, _LANES)

    operands = tuple(_prep(a) for a in args)

    spec = pl.BlockSpec((block_rows, _LANES), lambda i: (i, 0))
    out = pl.pallas_call(
        _molweight_kernel,
        out_shape=jax.ShapeDtypeStruct((rows_pad, _LANES), dtype),
        grid_spec=pltpu.PrefetchScalarGridSpec(
            num_scalar_prefetch=0,
            grid=(rows_pad // block_rows,),
            in_specs=[spec] * 6,
            out_specs=spec,
        ),
        compiler_params=pltpu.CompilerParams(
            dimension_semantics=("parallel",)),
    )(*operands)

    if pad:
        return out.reshape(-1)[:n].reshape(shape)
    return out.reshape(shape)


def _reference(M, alpha_1, alpha_2, beta, Mcr, k_1):
    # Literal transcription of the PyTorch forward (two explicit sigmoids).
    low_mw = k_1 + alpha_1 * M
    k_2 = k_1 + (alpha_1 - alpha_2) * Mcr
    high_mw = k_2 + alpha_2 * M
    high_weight = 1.0 / (1.0 + jnp.exp(-beta * (M - Mcr)))
    low_weight = 1.0 / (1.0 + jnp.exp(-beta * (Mcr - M)))
    return low_mw * low_weight + high_mw * high_weight


def _make_inputs(key, batch):
    kM, k1, k2, kb, kc, kk = jax.random.split(key, 6)
    M = jax.random.uniform(kM, (batch, 1), jnp.float32, 2.0, 6.0)   # log10 MW
    alpha_1 = jax.random.uniform(k1, (batch, 1), jnp.float32, 0.1, 0.3)
    alpha_2 = jax.random.uniform(k2, (batch, 1), jnp.float32, 0.5, 0.9)
    beta = jax.random.uniform(kb, (batch, 1), jnp.float32, 1.0, 3.0)
    Mcr = jax.random.uniform(kc, (batch, 1), jnp.float32, 3.0, 5.0)
    k_1 = jax.random.uniform(kk, (batch, 1), jnp.float32, -0.5, 0.5)
    return M, alpha_1, alpha_2, beta, Mcr, k_1


if __name__ == "__main__":
    key = jax.random.PRNGKey(0)
    k_small, k_mid, k_big = jax.random.split(key, 3)

    # Real Visc_PENN-sized case (B=8): takes the fused pure-JAX fast path.
    B = 8
    inputs = _make_inputs(k_small, B)
    out = jax.block_until_ready(molweight(*inputs))
    ref = _reference(*inputs)
    assert out.shape == (B, 1) and out.dtype == jnp.float32
    assert jnp.allclose(out, ref, rtol=1e-5, atol=1e-5)

    # Exact-fit tiled case: n = 2048 -> 16 rows -> 2 blocks, no pad/slice copy.
    B2 = 2048
    inputs2 = _make_inputs(k_mid, B2)
    out2 = jax.block_until_ready(molweight(*inputs2))
    ref2 = _reference(*inputs2)
    assert out2.shape == (B2, 1) and out2.dtype == jnp.float32
    assert jnp.allclose(out2, ref2, rtol=1e-5, atol=1e-5)

    # Padded, multi-block case exercising the tail-slice path.
    B3 = 3000
    inputs3 = _make_inputs(k_big, B3)
    out3 = jax.block_until_ready(molweight(*inputs3, max_block_rows=8))
    ref3 = _reference(*inputs3)
    assert out3.shape == (B3, 1) and out3.dtype == jnp.float32
    assert jnp.allclose(out3, ref3, rtol=1e-5, atol=1e-5)

    print("KERNEL_OK")
</pallas_src>

<mosaic_0001>
module attributes {stable_mosaic.version = 11 : i64} {
  func.func @_molweight_kernel(%arg0: i32, %arg1: memref<8x128xf32, #tpu.memory_space<vmem>>, %arg2: memref<8x128xf32, #tpu.memory_space<vmem>>, %arg3: memref<8x128xf32, #tpu.memory_space<vmem>>, %arg4: memref<8x128xf32, #tpu.memory_space<vmem>>, %arg5: memref<8x128xf32, #tpu.memory_space<vmem>>, %arg6: memref<8x128xf32, #tpu.memory_space<vmem>>, %arg7: memref<8x128xf32, #tpu.memory_space<vmem>>) attributes {dimension_semantics = [#tpu.dimension_semantics<parallel>], iteration_bounds = array<i64: 2>, scalar_prefetch = 0 : i64, scratch_operands = 0 : i64, tpu.core_type = #tpu.core_type<tc>, window_params = [{transform_indices = @transform_0, window_bounds = array<i64: 8, 128>}, {transform_indices = @transform_1, window_bounds = array<i64: 8, 128>}, {transform_indices = @transform_2, window_bounds = array<i64: 8, 128>}, {transform_indices = @transform_3, window_bounds = array<i64: 8, 128>}, {transform_indices = @transform_4, window_bounds = array<i64: 8, 128>}, {transform_indices = @transform_5, window_bounds = array<i64: 8, 128>}, {transform_indices = @transform_6, window_bounds = array<i64: 8, 128>}]} {
    %c0 = arith.constant 0 : index
    %c0_0 = arith.constant 0 : index
    %0 = vector.load %arg1[%c0, %c0_0] : memref<8x128xf32, #tpu.memory_space<vmem>>, vector<8x128xf32>
    %c0_1 = arith.constant 0 : index
    %c0_2 = arith.constant 0 : index
    %1 = vector.load %arg2[%c0_1, %c0_2] : memref<8x128xf32, #tpu.memory_space<vmem>>, vector<8x128xf32>
    %c0_3 = arith.constant 0 : index
    %c0_4 = arith.constant 0 : index
    %2 = vector.load %arg3[%c0_3, %c0_4] : memref<8x128xf32, #tpu.memory_space<vmem>>, vector<8x128xf32>
    %c0_5 = arith.constant 0 : index
    %c0_6 = arith.constant 0 : index
    %3 = vector.load %arg4[%c0_5, %c0_6] : memref<8x128xf32, #tpu.memory_space<vmem>>, vector<8x128xf32>
    %c0_7 = arith.constant 0 : index
    %c0_8 = arith.constant 0 : index
    %4 = vector.load %arg5[%c0_7, %c0_8] : memref<8x128xf32, #tpu.memory_space<vmem>>, vector<8x128xf32>
    %c0_9 = arith.constant 0 : index
    %c0_10 = arith.constant 0 : index
    %5 = vector.load %arg6[%c0_9, %c0_10] : memref<8x128xf32, #tpu.memory_space<vmem>>, vector<8x128xf32>
    %6 = arith.subf %0, %4 : vector<8x128xf32>
    %7 = arith.mulf %3, %6 : vector<8x128xf32>
    %cst = arith.constant 5.000000e-01 : f32
    %8 = vector.broadcast %cst : f32 to vector<8x128xf32>
    %9 = arith.mulf %8, %7 : vector<8x128xf32>
    %10 = math.tanh %9 : vector<8x128xf32>
    %cst_11 = arith.constant 1.000000e+00 : f32
    %11 = vector.broadcast %cst_11 : f32 to vector<8x128xf32>
    %12 = arith.addf %11, %10 : vector<8x128xf32>
    %cst_12 = arith.constant 5.000000e-01 : f32
    %13 = vector.broadcast %cst_12 : f32 to vector<8x128xf32>
    %14 = arith.mulf %13, %12 : vector<8x128xf32>
    %15 = arith.mulf %1, %0 : vector<8x128xf32>
    %16 = arith.addf %5, %15 : vector<8x128xf32>
    %17 = arith.subf %2, %1 : vector<8x128xf32>
    %18 = arith.mulf %17, %6 : vector<8x128xf32>
    %19 = arith.mulf %18, %14 : vector<8x128xf32>
    %20 = arith.addf %16, %19 : vector<8x128xf32>
    %c0_13 = arith.constant 0 : index
    %c0_14 = arith.constant 0 : index
    %21 = vector.load %arg7[%c0_13, %c0_14] : memref<8x128xf32, #tpu.memory_space<vmem>>, vector<8x128xf32>
    tpu.vector_store %arg7[%c0_13, %c0_14], %20 {strides = array<i32>} : memref<8x128xf32, #tpu.memory_space<vmem>>, vector<8x128xf32>,
    return
  }
  func.func @transform_0(%arg0: i32) -> (i32, i32) {
    %c0_i32 = arith.constant 0 : i32
    %c0_i32_0 = arith.constant 0 : i32
    return %arg0, %c0_i32 : i32, i32
  }
  func.func @transform_1(%arg0: i32) -> (i32, i32) {
    %c0_i32 = arith.constant 0 : i32
    %c0_i32_0 = arith.constant 0 : i32
    return %arg0, %c0_i32 : i32, i32
  }
  func.func @transform_2(%arg0: i32) -> (i32, i32) {
    %c0_i32 = arith.constant 0 : i32
    %c0_i32_0 = arith.constant 0 : i32
    return %arg0, %c0_i32 : i32, i32
  }
  func.func @transform_3(%arg0: i32) -> (i32, i32) {
    %c0_i32 = arith.constant 0 : i32
    %c0_i32_0 = arith.constant 0 : i32
    return %arg0, %c0_i32 : i32, i32
  }
  func.func @transform_4(%arg0: i32) -> (i32, i32) {
    %c0_i32 = arith.constant 0 : i32
    %c0_i32_0 = arith.constant 0 : i32
    return %arg0, %c0_i32 : i32, i32
  }
  func.func @transform_5(%arg0: i32) -> (i32, i32) {
    %c0_i32 = arith.constant 0 : i32
    %c0_i32_0 = arith.constant 0 : i32
    return %arg0, %c0_i32 : i32, i32
  }
  func.func @transform_6(%arg0: i32) -> (i32, i32) {
    %c0_i32 = arith.constant 0 : i32
    %c0_i32_0 = arith.constant 0 : i32
    return %arg0, %c0_i32 : i32, i32
  }
}

</mosaic_0001>

<bundles_post_ra>
// kernel: tpu_custom_call.1
= control target key start
LH: loop header
LB: loop body
LE: loop exit
PB: predicated region body
PF: predicated region fallthrough
CT: control target
= control target key end

     0   :  { %s1349_s0 = inlined_call_operand.hbm [shape: f32[16,128], index: 0, kind: input, shape index: {}]   ;;  %s1350_s1 = inlined_call_operand.hbm [shape: f32[16,128], index: 1, kind: input, shape index: {}]   ;;  %s1351_s2 = inlined_call_operand.hbm [shape: f32[16,128], index: 2, kind: input, shape index: {}]   ;;  %s1352_s3 = inlined_call_operand.hbm [shape: f32[16,128], index: 3, kind: input, shape index: {}]   ;;  %s1353_s4 = inlined_call_operand.hbm [shape: f32[16,128], index: 4, kind: input, shape index: {}]   ;;  %s1354_s5 = inlined_call_operand.hbm [shape: f32[16,128], index: 5, kind: input, shape index: {}]   ;;  %s1355_s6 = inlined_call_operand.hbm [shape: f32[16,128], index: 6, kind: output, shape index: {}]  }
   0x1   :  { %1365 = sst [smem:[#allocation25_spill]] %s1349_s0 }
   0x2   :  { %1366 = sst [smem:[#allocation26_spill]] %s1350_s1 }
   0x3   :  { %1367 = sst [smem:[#allocation27_spill]] %s1352_s3 }
   0x4   :  { %11 = vsyncpa [#allocation3], 0 }
   0x5   :  { %13 = vsyncpa [#allocation3 + $0x1], 0 }
   0x6   :  { %14 = vsyncpa [#allocation6], 0 }
   0x7   :  { %16 = vsyncpa [#allocation6 + $0x1], 0 }
   0x8   :  { %17 = vsyncpa [#allocation9], 0 }
   0x9   :  { %19 = vsyncpa [#allocation9 + $0x1], 0 }
   0xa   :  { %20 = vsyncpa [#allocation12], 0 }
   0xb   :  { %22 = vsyncpa [#allocation12 + $0x1], 0 }
   0xc   :  { %23 = vsyncpa [#allocation4], 0 }
   0xd   :  { %25 = vsyncpa [#allocation4 + $0x1], 0  ;;  %s1046_s21 = smov 0   ;;  %s1048_s22 = smov 0  }
   0xe   :  { %s1050_s23 = smov 0   ;;  %s1052_s24 = smov 0  }
   0xf LB: > { %1368 = sst [smem:[#allocation19_spill]] %s990_s21  ;;  %s1067_s25 = sadd.s32 4294967295, %s1002_s24   ;;  %s1002_s24 = sphi %s1052_s24, %s1393_s24   ;;  %s998_s23 = sphi %s1050_s23, %s1395_s23   ;;  %s994_s22 = sphi %s1048_s22, %s1397_s22   ;;  %s990_s21 = sphi %s1046_s21, %s1396_s21  }
  0x10   : > { %1369 = sst [smem:[#allocation20_spill]] %s998_s23  ;;  %s658_s26 = sadd.s32 4294967294, %s1002_s24  }
  0x11   : > { %1370 = sst [smem:[#allocation21_spill]] %s1002_s24  ;;  %s1071_s27 = sadd.s32 1, %s1002_s24  }
  0x12   : > { %1371 = sst [smem:[#allocation22_spill]] %s1071_s27  ;;  %s38_s28 = sadd.s32 1, %s998_s23 }
  0x13   : > { %s35_s29 = ssub.s32 %s1002_s24, %s1071_s27  ;;  %p45_p0 = scmp.ne.s32.totalorder %s998_s23, %s994_s22 }
  0x14   : > { %p36_p1 = scmp.eq.s32.totalorder %s35_s29, 0  ;;  %p46_p2 = scmp.eq.s32.totalorder %s1002_s24, 0 }
  0x15   : > { %p51_p3 = scmp.ne.s32.totalorder %s994_s22, %s990_s21  ;;  %p52_p4 = scmp.eq.s32.totalorder %s1067_s25, 0 }
  0x16   : > { %s1083_s30 = scalar_select %p36_p1, %s998_s23, %s38_s28  }
  0x17   : > { %p47_p5 = por %p46_p2, %p45_p0  ;;  %p1085_p6 = por %p52_p4, %p51_p3 }
  0x18   : > { %1372 = sst [smem:[#allocation23_spill]] %s1083_s30  ;;  %p205_p7 = scmp.eq.s32.totalorder %s1067_s25, 1 }
  0x19   : > { %s1373_s7 = scalar_select %p1085_p6, 1, 0 }
  0x1a   : > { %p211_p8 = scmp.eq.s32.totalorder %s658_s26, 1  ;;  %p722_p10 = scmp.lt.s32.totalorder %s1002_s24, 2 }
  0x1b   : > { %p1092_p11 = por %p205_p7, %p45_p0  ;;  %s1101_s10 = sand.u32 1, %s998_s23  }
  0x1c   : > { %p1096_p12 = por %p211_p8, %p51_p3  ;;  %s1104_s11 = sshll.u32 %s1002_s24, 7 }
  0x1d   : > { %s1374_s8 = scalar_select %p1092_p11, 1, 0 }
  0x1e   : > { %s1375_s9 = scalar_select %p1096_p12, 1, 0 }
  0x1f   : > { %s1107_s12 = sshll.u32 %s1101_s10, 3  ;;  %p1109_p13 = pnand %p722_p10, %p47_p5 }
  0x20   : > { %1376 = sst [smem:[#allocation24_spill]] %s1375_s9  ;;  %s1356_s14 = sand.u32 1, %s1002_s24  }
  0x21   : > { %s1378_s1 = sld [smem:[#allocation26_spill]]  ;;  %s253_s18 = scalar_lea.vmem [#allocation5], %s1107_s12 }
  0x22   : > { %s260_s19 = sshll.u32 %s253_s18, 4  ;;  %s1124_s20 = scalar_lea.sflag [#allocation6], %s1356_s14  ;;  %s261_s19 = int_to_ptr.vmem [resolvable:$true] %s260_s19 }
  0x23   : > { %p1130_p2 = pneg %p1109_p13 }
  0x27   : > { %s1118_s17 = scalar_lea.hbm %s1378_s1, %s1104_s11  ;;  %s763_s16 = scalar_lea.hbm %s1378_s1, 256 }
  0x28   : > { %s758_s26 = scalar_lea.hbm %s1118_s17, 128  ;;  %p764_p5 = scmp.lt.s32.totalorder %s1118_s17, %s1378_s1 }
  0x29   : > { %p759_p1 = scmp.ne.s32.totalorder %s1118_s17, %s758_s26  ;;  %p765_p7 = scmp.lt.s32.totalorder %s763_s16, %s758_s26 }
  0x2b   : > { %p761_p3 = pnand %p1130_p2, %p759_p1  ;;  %p766_p8 = por %p765_p7, %p764_p5 }
  0x2d   : > { %p762_p4 = pneg %p761_p3 }
  0x2f   : > { %p767_p10 = pnand %p766_p8, %p762_p4 }
  0x31   : > { %770 = shalt.err (!%p767_p10)
}
  0x32   : > { %s771_s14 = scalar_lea.vmem %s261_s19, 128  ;;  %s1004_s23 = smov [#allocation5]  }
  0x33   : > { %p772_p9 = scmp.ne.s32.totalorder %s261_s19, %s771_s14  ;;  %s776_s27 = sshll.u32 %s1004_s23, 4  ;;  %s777_s27 = int_to_ptr.vmem [resolvable:$false] %s776_s27 }
  0x34   : > { %s778_s9 = scalar_lea.vmem %s777_s27, 256  ;;  %p779_p1 = scmp.lt.s32.totalorder %s261_s19, %s777_s27 }
  0x35   : > { %p774_p0 = pnand %p772_p9, %p1130_p2  ;;  %p780_p3 = scmp.lt.s32.totalorder %s778_s9, %s771_s14 }
  0x37   : > { %p775_p12 = pneg %p774_p0  ;;  %p781_p11 = por %p780_p3, %p779_p1 }
  0x39   : > { %p782_p6 = pnand %p781_p11, %p775_p12 }
  0x3b   : > { %785 = shalt.err (!%p782_p6)
}
  0x3c   : > { %705 = dma.hbm_to_vmem [thread:$0]  (!%p1109_p13), %s1118_s17, 128, %s261_s19, %s1124_s20  }
  0x3d   : > { %p337_p9 = scmp.lt.s32.totalorder %s1002_s24, 3  ;;  %s1380_s3 = sld [smem:[#allocation27_spill]] }
  0x3e   : > { %p1381_p0 = scmp.ge.s32.totalorder %s1002_s24, 1  ;;  %s289_s14 = scalar_lea.vmem [#allocation8], %s1107_s12 }
  0x3f   : > { %s296_s26 = sshll.u32 %s289_s14, 4  ;;  %s1383_s29 = sand.u32 1, %s1002_s24   ;;  %s297_s26 = int_to_ptr.vmem [resolvable:$true] %s296_s26 }
  0x40   : > { %p1158_p6 = pnand %p1381_p0, %p337_p9  ;;  %s1165_s15 = scalar_lea.sflag [#allocation9], %s1383_s29 }
  0x42   : > { %s1382_s9 = scalar_select %p1158_p6, 1, 0 }
  0x43   : > { %s1154_s27 = scalar_lea.hbm %s1380_s3, %s1104_s11  ;;  %s791_s18 = scalar_lea.hbm %s1380_s3, 256 }
  0x44   : > { %s786_s17 = scalar_lea.hbm %s1154_s27, 128  ;;  %p792_p5 = scmp.lt.s32.totalorder %s1154_s27, %s1380_s3 }
  0x45   : > { %p787_p11 = scmp.ne.s32.totalorder %s1154_s27, %s786_s17  ;;  %p793_p7 = scmp.lt.s32.totalorder %s791_s18, %s786_s17 }
  0x47   : > { %p789_p12 = pnand %p787_p11, %p1130_p2  ;;  %p794_p8 = por %p793_p7, %p792_p5 }
  0x49   : > { %p790_p4 = pneg %p789_p12 }
  0x4b   : > { %p795_p10 = pnand %p794_p8, %p790_p4 }
  0x4d   : > { %798 = shalt.err (!%p795_p10)
}
  0x4e   : > { %s799_s14 = scalar_lea.vmem %s297_s26, 128  ;;  %s1005_s29 = smov [#allocation8]  }
  0x4f   : > { %p800_p1 = scmp.ne.s32.totalorder %s297_s26, %s799_s14  ;;  %s804_s1 = sshll.u32 %s1005_s29, 4  ;;  %s805_s1 = int_to_ptr.vmem [resolvable:$false] %s804_s1 }
  0x50   : > { %s806_s24 = scalar_lea.vmem %s805_s1, 256  ;;  %p807_p0 = scmp.lt.s32.totalorder %s297_s26, %s805_s1 }
  0x51   : > { %p802_p3 = pnand %p800_p1, %p1130_p2  ;;  %p808_p11 = scmp.lt.s32.totalorder %s806_s24, %s799_s14 }
  0x53   : > { %p803_p9 = pneg %p802_p3  ;;  %p809_p12 = por %p808_p11, %p807_p0 }
  0x55   : > { %p810_p6 = pnand %p809_p12, %p803_p9 }
  0x57   : > { %813 = shalt.err (!%p810_p6)
}
  0x58   : > { %711 = dma.hbm_to_vmem [thread:$0]  (!%p1109_p13), %s1154_s27, 128, %s297_s26, %s1165_s15  }
  0x59   : > { %s1384_s0 = sld [smem:[#allocation25_spill]]  ;;  %s235_s1 = scalar_lea.vmem [#allocation2], %s1107_s12 }
  0x5a   : > { %s242_s24 = sshll.u32 %s235_s1, 4  ;;  %s1195_s30 = scalar_lea.hbm %s1351_s2, %s1104_s11  ;;  %s243_s24 = int_to_ptr.vmem [resolvable:$true] %s242_s24 }
  0x5b   : > { %s232_s14 = scalar_lea.sflag [#allocation3], %s1101_s10 }
  0x5f   : > { %s1188_s16 = scalar_lea.hbm %s1384_s0, %s1104_s11  ;;  %s819_s17 = scalar_lea.hbm %s1384_s0, 256 }
  0x60   : > { %s814_s29 = scalar_lea.hbm %s1188_s16, 128  ;;  %p820_p7 = scmp.lt.s32.totalorder %s1188_s16, %s1384_s0 }
  0x61   : > { %p815_p6 = scmp.ne.s32.totalorder %s1188_s16, %s814_s29  ;;  %p821_p8 = scmp.lt.s32.totalorder %s819_s17, %s814_s29 }
  0x63   : > { %p817_p4 = pnand %p815_p6, %p1130_p2  ;;  %p822_p10 = por %p821_p8, %p820_p7 }
  0x65   : > { %p818_p5 = pneg %p817_p4 }
  0x67   : > { %p823_p1 = pnand %p822_p10, %p818_p5 }
  0x69   : > { %826 = shalt.err (!%p823_p1)
}
  0x6a   : > { %s827_s1 = scalar_lea.vmem %s243_s24, 128  ;;  %s1006_s18 = smov [#allocation2]  }
  0x6b   : > { %p828_p3 = scmp.ne.s32.totalorder %s243_s24, %s827_s1  ;;  %s832_s23 = sshll.u32 %s1006_s18, 4  ;;  %s833_s23 = int_to_ptr.vmem [resolvable:$false] %s832_s23 }
  0x6c   : > { %s834_s21 = scalar_lea.vmem %s833_s23, 256  ;;  %p835_p11 = scmp.lt.s32.totalorder %s243_s24, %s833_s23 }
  0x6d   : > { %p830_p9 = pnand %p828_p3, %p1130_p2  ;;  %p836_p12 = scmp.lt.s32.totalorder %s834_s21, %s827_s1 }
  0x6f   : > { %p831_p0 = pneg %p830_p9  ;;  %p837_p6 = por %p836_p12, %p835_p11 }
  0x71   : > { %p838_p4 = pnand %p837_p6, %p831_p0 }
  0x73   : > { %841 = shalt.err (!%p838_p4)
}
  0x74   : > { %702 = dma.hbm_to_vmem [thread:$0]  (!%p1109_p13), %s1188_s16, 128, %s243_s24, %s232_s14  }
  0x75   : > { %s271_s3 = scalar_lea.vmem [#allocation7], %s1107_s12  ;;  %s1219_s21 = scalar_lea.hbm %s1353_s4, %s1104_s11 }
  0x76   : > { %s278_s29 = sshll.u32 %s271_s3, 4  ;;  %s842_s17 = scalar_lea.hbm %s1195_s30, 128  ;;  %s279_s29 = int_to_ptr.vmem [resolvable:$true] %s278_s29 }
  0x77   : > { %p843_p5 = scmp.ne.s32.totalorder %s1195_s30, %s842_s17  ;;  %s847_s18 = scalar_lea.hbm %s1351_s2, 256 }
  0x78   : > { %p848_p10 = scmp.lt.s32.totalorder %s1195_s30, %s1351_s2  ;;  %p849_p1 = scmp.lt.s32.totalorder %s847_s18, %s842_s17 }
  0x79   : > { %p845_p7 = pnand %p843_p5, %p1130_p2 }
  0x7a   : > { %p850_p3 = por %p849_p1, %p848_p10 }
  0x7b   : > { %p846_p8 = pneg %p845_p7 }
  0x7d   : > { %p851_p9 = pnand %p850_p3, %p846_p8 }
  0x7f   : > { %854 = shalt.err (!%p851_p9)
}
  0x80   : > { %s855_s16 = scalar_lea.vmem %s279_s29, 128  ;;  %s1007_s24 = smov [#allocation7]  }
  0x81   : > { %p856_p0 = scmp.ne.s32.totalorder %s279_s29, %s855_s16  ;;  %s860_s14 = sshll.u32 %s1007_s24, 4  ;;  %s861_s14 = int_to_ptr.vmem [resolvable:$false] %s860_s14 }
  0x82   : > { %s862_s3 = scalar_lea.vmem %s861_s14, 256  ;;  %p863_p6 = scmp.lt.s32.totalorder %s279_s29, %s861_s14 }
  0x83   : > { %p858_p11 = pnand %p856_p0, %p1130_p2  ;;  %p864_p4 = scmp.lt.s32.totalorder %s862_s3, %s855_s16 }
  0x85   : > { %p859_p12 = pneg %p858_p11  ;;  %p865_p5 = por %p864_p4, %p863_p6 }
  0x87   : > { %p866_p7 = pnand %p865_p5, %p859_p12 }
  0x89   : > { %869 = shalt.err (!%p866_p7)
}
  0x8a   : > { %708 = dma.hbm_to_vmem [thread:$0]  (!%p1109_p13), %s1195_s30, 128, %s279_s29, %s1124_s20  }
  0x8b   : > { %s307_s0 = scalar_lea.vmem [#allocation10], %s1107_s12  ;;  %s870_s26 = scalar_lea.hbm %s1219_s21, 128 }
  0x8c   : > { %s314_s27 = sshll.u32 %s307_s0, 4  ;;  %p871_p8 = scmp.ne.s32.totalorder %s1219_s21, %s870_s26  ;;  %s315_s27 = int_to_ptr.vmem [resolvable:$true] %s314_s27 }
  0x8d   : > { %s875_s1 = scalar_lea.hbm %s1353_s4, 256  ;;  %p876_p3 = scmp.lt.s32.totalorder %s1219_s21, %s1353_s4 }
  0x8e   : > { %p873_p10 = pnand %p871_p8, %p1130_p2  ;;  %p877_p9 = scmp.lt.s32.totalorder %s875_s1, %s870_s26 }
  0x90   : > { %p874_p1 = pneg %p873_p10  ;;  %p878_p0 = por %p877_p9, %p876_p3 }
  0x92   : > { %p879_p11 = pnand %p878_p0, %p874_p1 }
  0x94   : > { %882 = shalt.err (!%p879_p11)
}
  0x95   : > { %s883_s20 = scalar_lea.vmem %s315_s27, 128  ;;  %s1008_s30 = smov [#allocation10]  }
  0x96   : > { %p884_p12 = scmp.ne.s32.totalorder %s315_s27, %s883_s20  ;;  %s888_s29 = sshll.u32 %s1008_s30, 4  ;;  %s889_s29 = int_to_ptr.vmem [resolvable:$false] %s888_s29 }
  0x97   : > { %s890_s16 = scalar_lea.vmem %s889_s29, 256  ;;  %p891_p5 = scmp.lt.s32.totalorder %s315_s27, %s889_s29 }
  0x98   : > { %p886_p6 = pnand %p884_p12, %p1130_p2  ;;  %p892_p7 = scmp.lt.s32.totalorder %s890_s16, %s883_s20 }
  0x9a   : > { %p887_p4 = pneg %p886_p6  ;;  %p893_p8 = por %p892_p7, %p891_p5 }
  0x9c   : > { %p894_p10 = pnand %p893_p8, %p887_p4 }
  0x9e   : > { %897 = shalt.err (!%p894_p10)
}
  0x9f   : > { %714 = dma.hbm_to_vmem [thread:$0]  (!%p1109_p13), %s1219_s21, 128, %s315_s27, %s1165_s15  }
  0xa0   : > { %s1260_s3 = scalar_lea.hbm %s1354_s5, %s1104_s11  ;;  %s325_s0 = scalar_lea.vmem [#allocation11], %s1107_s12 }
  0xa1   : > { %s332_s26 = sshll.u32 %s325_s0, 4  ;;  %s322_s17 = scalar_lea.sflag [#allocation12], %s1101_s10  ;;  %s333_s26 = int_to_ptr.vmem [resolvable:$true] %s332_s26 }
  0xa2   : > { %s898_s19 = scalar_lea.hbm %s1260_s3, 128  ;;  %s903_s15 = scalar_lea.hbm %s1354_s5, 256 }
  0xa3   : > { %p899_p1 = scmp.ne.s32.totalorder %s1260_s3, %s898_s19  ;;  %p904_p0 = scmp.lt.s32.totalorder %s1260_s3, %s1354_s5 }
  0xa4   : > { %p905_p11 = scmp.lt.s32.totalorder %s903_s15, %s898_s19 }
  0xa5   : > { %p901_p3 = pnand %p899_p1, %p1130_p2 }
  0xa6   : > { %p906_p12 = por %p905_p11, %p904_p0 }
  0xa7   : > { %p902_p9 = pneg %p901_p3 }
  0xa9   : > { %p907_p6 = pnand %p906_p12, %p902_p9 }
  0xab   : > { %910 = shalt.err (!%p907_p6)
}
  0xac   : > { %s911_s11 = scalar_lea.vmem %s333_s26, 128  ;;  %s1009_s10 = smov [#allocation11]  }
  0xad   : > { %p912_p4 = scmp.ne.s32.totalorder %s333_s26, %s911_s11  ;;  %s916_s12 = sshll.u32 %s1009_s10, 4  ;;  %s917_s12 = int_to_ptr.vmem [resolvable:$false] %s916_s12 }
  0xae   : > { %s918_s23 = scalar_lea.vmem %s917_s12, 256  ;;  %p919_p8 = scmp.lt.s32.totalorder %s333_s26, %s917_s12 }
  0xaf   : > { %p914_p5 = pnand %p912_p4, %p1130_p2  ;;  %p920_p10 = scmp.lt.s32.totalorder %s918_s23, %s911_s11 }
  0xb1   : > { %p915_p7 = pneg %p914_p5  ;;  %p921_p1 = por %p920_p10, %p919_p8 }
  0xb3   : > { %p922_p3 = pnand %p921_p1, %p915_p7 }
  0xb5   : > { %925 = shalt.err (!%p922_p3)
}
  0xb6   : > { %717 = dma.hbm_to_vmem [thread:$0]  (!%p1109_p13), %s1260_s3, 128, %s333_s26, %s322_s17  }
  0xb7   : > { %p1385_p9 = scmp.ne.s32.totalorder %s1382_s9, 0 }
  0xb8   : > { %s1283_s28 = sand.u32 (!%p1385_p9), 1, %s994_s22   ;;  %p1386_p2 = scmp.ne.s32.totalorder (!%p1385_p9), %s1373_s7, 0 }
  0xb9   : > { %341 = sbr.rel (%p1385_p9) target bundleno = 243 (0xf3), region = 44  ;;  %s1286_s20 = sshll.u32 (!%p1385_p9), %s1283_s28, 3 }
  0xba   : > { %s344_s30 = scalar_lea.sflag (!%p1385_p9), [#allocation3], %s1283_s28  ;;  %s347_s29 = scalar_lea.vmem (!%p1385_p9), [#allocation2], %s1286_s20 }
  0xbe   : > { %969 = dma.done.wait (%p1386_p2), %s344_s30, 128  }
  0xbf   : > { %971 = vsyncadd (%p1386_p2), %s344_s30, 4294967168  ;;  %s352_s13 = sand.u32 1, %s1067_s25   ;;  %s356_s16 = scalar_lea.vmem [#allocation5], %s1286_s20 }
  0xc0   : > { %s353_s9 = scalar_lea.sflag [#allocation6], %s352_s13 }
  0xc1   : > { %973 = dma.done.wait (%p1386_p2), %s353_s9, 256  }
  0xc2   : > { %975 = vsyncadd (%p1386_p2), %s353_s9, 4294967040  ;;  %s365_s24 = scalar_lea.vmem [#allocation7], %s1286_s20  ;;  %s371_s14 = scalar_lea.sflag [#allocation9], %s352_s13 }
  0xc3   : > { %s374_s3 = scalar_lea.vmem [#allocation8], %s1286_s20 }
  0xc4   : > { %977 = dma.done.wait (%p1386_p2), %s371_s14, 256  }
  0xc5   : > { %979 = vsyncadd (%p1386_p2), %s371_s14, 4294967040  ;;  %s383_s0 = scalar_lea.vmem [#allocation10], %s1286_s20  ;;  %s389_s26 = scalar_lea.sflag [#allocation12], %s1283_s28 }
  0xc6   : > { %s392_s17 = scalar_lea.vmem [#allocation11], %s1286_s20 }
  0xc7   : > { %981 = dma.done.wait (%p1386_p2), %s389_s26, 128  }
  0xc8   : > { %983 = vsyncadd (%p1386_p2), %s389_s26, 4294967168  ;;  %v446_v0 = vld [vmem:[%s347_s29] sm:$0xff]  ;;  %v449_v1 = vld [vmem:[%s374_s3] sm:$0xff]  ;;  %s445_s7 = scalar_lea.vmem [#allocation13], %s1286_s20  ;;  %s682_s1 = sshll.u32 %s1067_s25, 7 }
  0xc9   : > { %v450_v2 = vld [vmem:[%s383_s0] sm:$0xff]  ;;  %v447_v6 = vld [vmem:[%s356_s16] sm:$0xff]  ;;  %s479_s19 = sshll.u32 %s445_s7, 4  ;;  %s477_s21 = scalar_lea.hbm %s1355_s6, %s682_s1  ;;  %s480_s19 = int_to_ptr.vmem [resolvable:$true] %s479_s19 }
  0xca   : > { %v452_v3 = vsub.f32 %v446_v0, %v450_v2  ;;  %v448_v7 = vld [vmem:[%s365_s24] sm:$0xff]  ;;  %v458_v9 = vmul.f32 %v447_v6, %v446_v0  ;;  %v451_v11 = vld [vmem:[%s392_s17] sm:$0xff]  ;;  %s466_s27 = scalar_lea.sflag [#allocation4], %s1283_s28  ;;  %s926_s11 = scalar_lea.vmem %s480_s19, 128 }
  0xcb   : > { %v460_v8 = vsub.f32 %v448_v7, %v447_v6  ;;  %p927_p13 = scmp.ne.s32.totalorder %s480_s19, %s926_s11  ;;  %p1387_p0 = scmp.ne.s32.totalorder %s1374_s8, 0 }
  0xcc   : > { %v453_v4 = vmul.f32 %v452_v3, %v449_v1  ;;  %v459_v15 = vadd.f32 %v458_v9, %v451_v11  ;;  %s1010_s10 = smov [#allocation13]  }
  0xcd   : > { %v461_v13 = vmul.f32 %v460_v8, %v452_v3  ;;  %p928_p11 = pnand %p927_p13, %p1387_p0  ;;  %s930_s12 = sshll.u32 %s1010_s10, 4  ;;  %s931_s12 = int_to_ptr.vmem [resolvable:$false] %s930_s12 }
  0xce   : > { %v454_v5 = vmul.f32 0.5, %v453_v4  ;;  %s932_s23 = scalar_lea.vmem %s931_s12, 256  ;;  %p933_p6 = scmp.lt.s32.totalorder %s480_s19, %s931_s12 }
  0xcf   : > { %p929_p12 = pneg %p928_p11  ;;  %p934_p4 = scmp.lt.s32.totalorder %s932_s23, %s926_s11 }
  0xd0   : > { %756 = vtanh.f32 %v454_v5 }
  0xd1   : > { %p935_p5 = por %p934_p4, %p933_p6 }
  0xd3   : > { %p936_p7 = pnand %p935_p5, %p929_p12 }
  0xdd   : > { %v757_v10 = vpop.eup %756 }
  0xde   : > { %v456_v12 = vadd.f32 1.0, %v757_v10 }
  0xe0   : > { %v457_v14 = vmul.f32 0.5, %v456_v12 }
  0xe2   : > { %v462_v16 = vmul.f32 %v461_v13, %v457_v14 }
  0xe4   : > { %v463_v17 = vadd.f32 %v462_v16, %v459_v15 }
  0xe6   : > { %464 = vst [vmem:[%s445_s7] sm:$0xff] %v463_v17 }
  0xe7   : > { %939 = shalt.err (!%p936_p7)
}
  0xe8   : > { %s940_s25 = scalar_lea.hbm %s477_s21, 128  ;;  %s944_s30 = scalar_lea.hbm %s1355_s6, 256 }
  0xe9   : > { %p941_p8 = scmp.ne.s32.totalorder %s477_s21, %s940_s25  ;;  %p945_p3 = scmp.lt.s32.totalorder %s477_s21, %s1355_s6 }
  0xea   : > { %p946_p9 = scmp.lt.s32.totalorder %s944_s30, %s940_s25 }
  0xeb   : > { %p942_p10 = pnand %p941_p8, %p1387_p0 }
  0xec   : > { %p947_p2 = por %p946_p9, %p945_p3 }
  0xed   : > { %p943_p1 = pneg %p942_p10 }
  0xef   : > { %p948_p13 = pnand %p947_p2, %p943_p1 }
  0xf1   : > { %951 = shalt.err (!%p948_p13)
}
  0xf2   : > { %697 = dma.vmem_to_hbm [thread:$0]  (%p1387_p0), %s480_s19, 128, %s477_s21, %s466_s27  }
  0xf3 PF: > { %s1388_s9 = sld [smem:[#allocation19_spill]] }
  0xf4   : > { %s1389_s16 = sld [smem:[#allocation24_spill]] }
  0xf5   : > { %s1390_s24 = sld [smem:[#allocation21_spill]] }
  0xf9   : > { %s491_s14 = sand.u32 1, %s1388_s9  }
  0xfa   : > { %p1391_p11 = scmp.ne.s32.totalorder %s1389_s16, 0  ;;  %s492_s3 = scalar_lea.sflag [#allocation4], %s491_s14 }
  0xfb   : > { %p1392_p12 = scmp.ge.s32.totalorder %s1390_s24, 2 }
  0xfd   : > { %p719_p6 = pnand %p1392_p12, %p1391_p11 }
  0xff   : > { %p720_p4 = pneg %p719_p6 }
 0x101   : > { %985 = dma.done.wait (%p720_p4), %s492_s3, 128  }
 0x102   : > { %987 = vsyncadd (%p720_p4), %s492_s3, 4294967168  ;;  %s1393_s24 = sld [smem:[#allocation22_spill]]  ;;  %s1396_s21 = smov %s994_s22 }
 0x103   : > { %s1394_s0 = sld [smem:[#allocation20_spill]] }
 0x104   : > { %s1395_s23 = sld [smem:[#allocation23_spill]] }
 0x108   : > { %p28_p5 = scmp.ge.s32.totalorder %s1393_s24, 4  }
 0x109   : > { %s1397_s22 = smov %s1394_s0 }
 0x10a   :  { %30 = sbr.rel (!%p28_p5) target bundleno = 15 (0xf), region = 150 }
 0x10f   :  { %497 = vsyncpa [#allocation3], 1 }
 0x110   :  { %499 = vsyncpa [#allocation3 + $0x1], 1 }
 0x111   :  { %500 = vsyncpa [#allocation6], 1 }
 0x112   :  { %502 = vsyncpa [#allocation6 + $0x1], 1 }
 0x113   :  { %503 = vsyncpa [#allocation9], 1 }
 0x114   :  { %505 = vsyncpa [#allocation9 + $0x1], 1 }
 0x115   :  { %506 = vsyncpa [#allocation12], 1 }
 0x116   :  { %508 = vsyncpa [#allocation12 + $0x1], 1 }
 0x117   :  { %509 = vsyncpa [#allocation4], 1 }
 0x118   :  { %511 = vsyncpa [#allocation4 + $0x1], 1 }

</bundles_post_ra>
